<compile_context>
chip_gen: v6e
topology: v6e:2x2x1
jax: 0.10.0
libtpu: 0.0.40
codegen_flags: <defaults>
</compile_context>

<pallas_src>
import jax
import jax.numpy as jnp
from jax.experimental import pallas as pl
from jax.experimental.pallas import tpu as pltpu


def _round_up(x, m):
    return ((x + m - 1) // m) * m


def _cell2entity_kernel(x_ref, w_ref, b_ref, o_ref):
    # x_ref: (tm, EH)   lane-dense flattened (entity, hidden) rows
    # w_ref: (EH, E)    block-diagonal per-entity weights (grid-invariant)
    # b_ref: (1, E)     bias, f32 (grid-invariant)
    # o_ref: (tm, E)    output rows (narrow, full-extent last dim)
    acc = jnp.dot(
        x_ref[...],
        w_ref[...],
        preferred_element_type=jnp.float32,
        precision=jax.lax.Precision.HIGHEST,
    )
    o_ref[...] = (acc + b_ref[...]).astype(o_ref.dtype)


def cell_to_entity_pallas(cell_states, weight, bias, *, tm=2048):
    """cell_states: (B, S, E, H); weight: (E, H); bias: (E,) -> (B, S, E).

    Caller contract: pass activations/weights in the dtype you want on the MXU
    (bf16 halves input HBM bytes on all generations; accumulation stays f32).
    """
    B, S, E, H = cell_states.shape
    dtype = cell_states.dtype
    R = B * S
    EH = E * H

    # Row tile: as large as requested, but capped so the parallel row axis has
    # at least 2 blocks (v7x megacore sharding).  Always a multiple of 8
    # sublanes; Pallas masks the trailing partial block, so no row padding.
    tm_cap = _round_up(pl.cdiv(R, 2), 8)
    tm_eff = max(8, min(_round_up(tm, 8), tm_cap))
    n_blocks = pl.cdiv(R, tm_eff)

    # Free reshape onto a lane-dense (R, E*H) layout — no pad, no HBM copy.
    x = cell_states.reshape(R, EH)

    # Block-diagonal weight: column e holds w_e on rows [e*H, (e+1)*H).
    # Built once in the wrapper; kept in the activation dtype.
    # TODO(synk): for large entity counts (E >~ 256) switch to an entity-blocked
    # grid axis instead of this O(E^2*H) dense block-diagonal weight.
    w_bd = (weight.astype(dtype)[:, :, None]
            * jnp.eye(E, dtype=dtype)[:, None, :]).reshape(EH, E)
    b2 = bias.astype(jnp.float32).reshape(1, E)

    out = pl.pallas_call(
        _cell2entity_kernel,
        out_shape=jax.ShapeDtypeStruct((R, E), dtype),
        grid_spec=pl.GridSpec(
            grid=(n_blocks,),
            in_specs=[
                # K extent == full EH axis (legal even when EH % 128 != 0).
                pl.BlockSpec((tm_eff, EH), lambda i: (i, 0)),
                # Grid-invariant operands: single-buffered to save VMEM.
                pl.BlockSpec((EH, E), lambda i: (0, 0),
                             pipeline_mode=pl.Buffered(1)),
                pl.BlockSpec((1, E), lambda i: (0, 0),
                             pipeline_mode=pl.Buffered(1)),
            ],
            # Narrow (tm, E) store: last dim equals the full array dim.
            out_specs=pl.BlockSpec((tm_eff, E), lambda i: (i, 0)),
        ),
        compiler_params=pltpu.CompilerParams(
            dimension_semantics=("parallel",),
            # Safe on v5e/v6e/v7x: above v5e's 16 MiB scoped default, well under
            # v7x's 64 MiB physical VMEM.  Tiles here are a few hundred KiB.
            vmem_limit_bytes=32 * 1024 * 1024,
        ),
    )(x, w_bd, b2)

    return out.reshape(B, S, E)


def make_params(hidden_size, entity_num, key):
    """Mimic nn.Linear(H, 1) init, then copy.deepcopy across entity_num layers
    (PyTorch deepcopy => all per-entity layers share identical initial values)."""
    kw, kb = jax.random.split(key)
    bound = 1.0 / jnp.sqrt(jnp.float32(hidden_size))
    w0 = jax.random.uniform(kw, (hidden_size,), jnp.float32, -bound, bound)
    b0 = jax.random.uniform(kb, (), jnp.float32, -bound, bound)
    W_all = jnp.tile(w0[None, :], (entity_num, 1))      # (entity_num, H)
    b_all = jnp.tile(b0[None], (entity_num,))           # (entity_num,)
    return W_all, b_all


if __name__ == "__main__":
    key = jax.random.PRNGKey(0)
    k_x, k_p = jax.random.split(key)

    # Small synthetic configuration.
    hidden_size = 32
    entity_num = 6
    entity_mask_S = [1, 0, 1, 1, 0, 1]   # 4 source entities selected
    entity_mask_T = [0, 1, 1, 0, 1, 1]   # (unused here; forward run for 'Source')

    B, S = 2, 8
    E_sel = sum(entity_mask_S)           # 4 -> E*H = 128 (one full lane row)

    # cell_states already sliced to the selected entities along dim 2,
    # matching cell_states[:, :, entity_idx, :] for entity_idx in range(E_sel).
    cell_states = jax.random.normal(k_x, (B, S, E_sel, hidden_size), jnp.float32)

    W_all, b_all = make_params(hidden_size, entity_num, k_p)
    sel_idx = jnp.array([i for i, m in enumerate(entity_mask_S) if m == 1],
                        dtype=jnp.int32)
    W_sel = W_all[sel_idx]               # (E_sel, H)
    b_sel = b_all[sel_idx]               # (E_sel,)

    out = cell_to_entity_pallas(cell_states, W_sel, b_sel)
    out = jax.block_until_ready(out)

    # Pure-JAX reference (exact f32 multiply + reduce).
    ref = jnp.sum(cell_states * W_sel[None, None, :, :], axis=-1) \
        + b_sel[None, None, :]
    assert out.shape == (B, S, E_sel)
    # precision=HIGHEST in-kernel => near-exact agreement with the f32 reference.
    assert jnp.allclose(out, ref, atol=1e-4, rtol=1e-4)

    print("KERNEL_OK")
</pallas_src>

<mosaic_0001>
module attributes {stable_mosaic.version = 11 : i64} {
  func.func @_cell2entity_kernel(%arg0: i32, %arg1: memref<8x128xf32, #tpu.memory_space<vmem>>, %arg2: memref<128x4xf32, #tpu.memory_space<vmem>>, %arg3: memref<1x4xf32, #tpu.memory_space<vmem>>, %arg4: memref<8x4xf32, #tpu.memory_space<vmem>>) attributes {dimension_semantics = [#tpu.dimension_semantics<parallel>], iteration_bounds = array<i64: 2>, scalar_prefetch = 0 : i64, scratch_operands = 0 : i64, tpu.core_type = #tpu.core_type<tc>, window_params = [{transform_indices = @transform_0, window_bounds = array<i64: 8, 128>}, {pipeline_mode = #tpu.pipeline_mode<synchronous>, transform_indices = @transform_1, window_bounds = array<i64: 128, 4>}, {pipeline_mode = #tpu.pipeline_mode<synchronous>, transform_indices = @transform_2, window_bounds = array<i64: 1, 4>}, {transform_indices = @transform_3, window_bounds = array<i64: 8, 4>}]} {
    %c0 = arith.constant 0 : index
    %c0_0 = arith.constant 0 : index
    %0 = vector.load %arg1[%c0, %c0_0] : memref<8x128xf32, #tpu.memory_space<vmem>>, vector<8x128xf32>
    %c0_1 = arith.constant 0 : index
    %c0_2 = arith.constant 0 : index
    %1 = vector.load %arg2[%c0_1, %c0_2] : memref<128x4xf32, #tpu.memory_space<vmem>>, vector<128x4xf32>
    %cst = arith.constant dense<0.000000e+00> : vector<8x4xf32>
    %2 = tpu.matmul %0, %1, %cst {dimension_numbers = #tpu.dot_dimension_numbers<[1], [0], [0], [1], [0, 0, 1, 1], [], []>, precision = #tpu.contract_precision<fp32>} : vector<8x128xf32>, vector<128x4xf32>, vector<8x4xf32> -> vector<8x4xf32>
    %c0_3 = arith.constant 0 : index
    %c0_4 = arith.constant 0 : index
    %3 = vector.load %arg3[%c0_3, %c0_4] : memref<1x4xf32, #tpu.memory_space<vmem>>, vector<1x4xf32>
    %4 = vector.broadcast %3 : vector<1x4xf32> to vector<8x4xf32>
    %5 = arith.addf %2, %4 : vector<8x4xf32>
    %c0_5 = arith.constant 0 : index
    %c0_6 = arith.constant 0 : index
    %6 = vector.load %arg4[%c0_5, %c0_6] : memref<8x4xf32, #tpu.memory_space<vmem>>, vector<8x4xf32>
    tpu.vector_store %arg4[%c0_5, %c0_6], %5 {strides = array<i32>} : memref<8x4xf32, #tpu.memory_space<vmem>>, vector<8x4xf32>,
    return
  }
  func.func @transform_0(%arg0: i32) -> (i32, i32) {
    %c0_i32 = arith.constant 0 : i32
    %c0_i32_0 = arith.constant 0 : i32
    return %arg0, %c0_i32 : i32, i32
  }
  func.func @transform_1(%arg0: i32) -> (i32, i32) {
    %c0_i32 = arith.constant 0 : i32
    %c0_i32_0 = arith.constant 0 : i32
    %c0_i32_1 = arith.constant 0 : i32
    return %c0_i32, %c0_i32_0 : i32, i32
  }
  func.func @transform_2(%arg0: i32) -> (i32, i32) {
    %c0_i32 = arith.constant 0 : i32
    %c0_i32_0 = arith.constant 0 : i32
    %c0_i32_1 = arith.constant 0 : i32
    return %c0_i32, %c0_i32_0 : i32, i32
  }
  func.func @transform_3(%arg0: i32) -> (i32, i32) {
    %c0_i32 = arith.constant 0 : i32
    %c0_i32_0 = arith.constant 0 : i32
    return %arg0, %c0_i32 : i32, i32
  }
}

</mosaic_0001>

<bundles_post_ra>
// kernel: tpu_custom_call.1
= control target key start
LH: loop header
LB: loop body
LE: loop exit
PB: predicated region body
PF: predicated region fallthrough
CT: control target
= control target key end

     0   :  { %s1248_s12 = smov 0   ;;  %s1696_s0 = inlined_call_operand.vmem [shape: f32[16,128], index: 0, kind: input, shape index: {}]   ;;  %s1697_s1 = inlined_call_operand.vmem [shape: f32[128,4], index: 1, kind: input, shape index: {}]   ;;  %s1698_s2 = inlined_call_operand.vmem [shape: f32[1,4], index: 2, kind: input, shape index: {}]   ;;  %s1699_s3 = inlined_call_operand.vmem [shape: f32[16,4], index: 3, kind: output, shape index: {}]  }
   0x1 LB: > { %s886_s13 = sadd.s32 4294967295, %s1224_s12   ;;  %p890_p0 = scmp.ge.s32.totalorder %s1224_s12, 1  ;;  %s1224_s12 = sphi %s1248_s12, %s13_s12  }
   0x2   : > { %p136_p1 = scmp.lt.s32.totalorder %s1224_s12, 3 }
   0x4   : > { %p137_p2 = pnand %p890_p0, %p136_p1 }
   0x5   : > { %p1267_p3 = scmp.lt.s32.totalorder (!%p137_p2), %s886_s13, 1 }
   0x6   : > { %140 = sbr.rel (%p137_p2) target bundleno = 317 (0x13d), region = 32 }
   0xb   : > { %v182_v0 = vld [vmem:[%s1697_s1 + $0x78] sm:$0xff]  ;;  %v181_v1 = vld [vmem:[%s1697_s1 + $0x70] sm:$0xff]  ;;  %v180_v2 = vld [vmem:[%s1697_s1 + $0x68] sm:$0xff]  ;;  %v1226_v3 = vmov 0.0   ;;  %vm1227_vm0 = vmmov 0   ;;  %s1702_s13 = smov (!%p1267_p3, %s886_s13), 1 }
   0xc   : > { %998 = vmatprep.subr.mxu0 %v1226_v3  ;;  %v1272_v4 = vand.u32 4294901760, %v182_v0  ;;  %v1274_v5 = vand.u32 4294901760, %v181_v1  ;;  %v1276_v6 = vand.u32 4294901760, %v180_v2  ;;  %v179_v7 = vld [vmem:[%s1697_s1 + $0x60] sm:$0xff]  ;;  %1033 = vmatprep.subr.mxu1 %v1226_v3  ;;  %v178_v8 = vld [vmem:[%s1697_s1 + $0x58] sm:$0xff]  ;;  %v177_v9 = vld [vmem:[%s1697_s1 + $0x50] sm:$0xff] }
   0xd   : > { %v1288_v10 = vand.u32 4294901760, %v179_v7  ;;  %v1290_v11 = vand.u32 4294901760, %v178_v8  ;;  %v1292_v12 = vand.u32 4294901760, %v177_v9  ;;  %v176_v13 = vld [vmem:[%s1697_s1 + $0x48] sm:$0xff]  ;;  %v175_v14 = vld [vmem:[%s1697_s1 + $0x40] sm:$0xff]  ;;  %1030 = vmatprep.mubr.msk.f32.mxu0 %vm1227_vm0, %v1226_v3  ;;  %1065 = vmatprep.mubr.msk.f32.mxu1 %vm1227_vm0, %v1226_v3  ;;  %v174_v19 = vld [vmem:[%s1697_s1 + $0x38] sm:$0xff] }
   0xe   : > { %999 = vmatpush3.msra.mxu0 %v1272_v4  ;;  %v1306_v15 = vsub.f32 %v182_v0, %v1272_v4  ;;  %v1309_v16 = vsub.f32 %v181_v1, %v1274_v5  ;;  %v1311_v17 = vand.u32 4294901760, %v176_v13  ;;  %v1314_v18 = vsub.f32 %v180_v2, %v1276_v6  ;;  %v173_v26 = vld [vmem:[%s1697_s1 + $0x30] sm:$0xff]  ;;  %s891_s8 = sshll.u32 %s1702_s13, 3  ;;  %v172_v36 = vld [vmem:[%s1697_s1 + $0x28] sm:$0xff]  ;;  %v171_v41 = vld [vmem:[%s1697_s1 + $0x20] sm:$0xff] }
   0xf   : > { %1000 = vmatprep.subr.mxu0 %v1226_v3  ;;  %v1327_v20 = vsub.f32 %v179_v7, %v1288_v10  ;;  %v1330_v21 = vsub.f32 %v178_v8, %v1290_v11  ;;  %v1336_v25 = vand.u32 4294901760, %v175_v14  ;;  %v1343_v28 = vand.u32 4294901760, %v174_v19  ;;  %s161_s17 = scalar_lea.vmem %s1696_s0, %s891_s8  ;;  %v170_v49 = vld [vmem:[%s1697_s1 + $0x18] sm:$0xff]  ;;  %v169_v54 = vld [vmem:[%s1697_s1 + $0x10] sm:$0xff]  ;;  %v168_v60 = vld [vmem:[%s1697_s1 + $0x8] sm:$0xff]  ;;  %s165_s30 = scalar_lea.vmem %s1699_s3, %s891_s8 }
  0x10   : > { %1001 = vmatpush3.msra.mxu0 %v1274_v5  ;;  %v284_v22 = vand.u32 4294901760, %v1306_v15  ;;  %v291_v23 = vand.u32 4294901760, %v1309_v16  ;;  %v298_v24 = vand.u32 4294901760, %v1314_v18  ;;  %v1347_v30 = vsub.f32 %v177_v9, %v1292_v12  ;;  %v166_v50 = vld [vmem:[%s161_s17] sm:$0xff] }
  0x11   : > { %1002 = vmatprep.subr.mxu0 %v1226_v3  ;;  %v305_v27 = vand.u32 4294901760, %v1327_v20  ;;  %v312_v29 = vand.u32 4294901760, %v1330_v21  ;;  %v1361_v34 = vsub.f32 %v176_v13, %v1311_v17  ;;  %v1364_v35 = vand.u32 4294901760, %v173_v26  ;;  %v167_v7 = vld [vmem:[%s1697_s1] sm:$0xff] }
  0x12   : > { %1003 = vmatpush3.msra.mxu0 %v1276_v6  ;;  %v285_v31 = vsub.f32 %v1306_v15, %v284_v22  ;;  %v292_v32 = vsub.f32 %v1309_v16, %v291_v23  ;;  %v299_v33 = vsub.f32 %v1314_v18, %v298_v24  ;;  %v319_v40 = vand.u32 4294901760, %v1347_v30 }
  0x13   : > { %1004 = vmatprep.subr.mxu0 %v1226_v3  ;;  %v306_v39 = vsub.f32 %v1327_v20, %v305_v27  ;;  %v313_v42 = vsub.f32 %v1330_v21, %v312_v29  ;;  %v1387_v43 = vsub.f32 %v175_v14, %v1336_v25  ;;  %v1390_v45 = vand.u32 4294901760, %v172_v36 }
  0x14   : > { %1005 = vmatpush3.msra.mxu0 %v1288_v10  ;;  %v286_v37 = vand.u32 4294901760, %v285_v31  ;;  %v293_v38 = vand.u32 4294901760, %v292_v32  ;;  %v300_v44 = vand.u32 4294901760, %v299_v33  ;;  %v326_v46 = vand.u32 4294901760, %v1361_v34 }
  0x15   : > { %1006 = vmatprep.subr.mxu0 %v1226_v3  ;;  %v1394_v47 = vsub.f32 %v174_v19, %v1343_v28  ;;  %v1398_v48 = vand.u32 4294901760, %v171_v41  ;;  %v307_v51 = vand.u32 4294901760, %v306_v39  ;;  %v320_v52 = vsub.f32 %v1347_v30, %v319_v40 }
  0x16   : > { %1007 = vmatpush3.msra.mxu0 %v1290_v11  ;;  %1034 = vmatpush3.msra.mxu1 %v286_v37  ;;  %v333_v53 = vand.u32 4294901760, %v1387_v43  ;;  %v1412_v55 = vsub.f32 %v173_v26, %v1364_v35  ;;  %v314_v56 = vand.u32 4294901760, %v313_v42  ;;  %v327_v58 = vsub.f32 %v1361_v34, %v326_v46 }
  0x17   : > { %1008 = vmatprep.subr.mxu0 %v1226_v3  ;;  %1035 = vmatprep.subr.mxu1 %v1226_v3  ;;  %v340_v57 = vand.u32 4294901760, %v1394_v47  ;;  %v1421_v59 = vand.u32 4294901760, %v170_v49  ;;  %v1427_v61 = vsub.f32 %v172_v36, %v1390_v45  ;;  %v1429_v62 = vand.u32 4294901760, %v166_v50 }
  0x18   : > { %1009 = vmatpush3.msra.mxu0 %v1292_v12  ;;  %1036 = vmatpush3.msra.mxu1 %v293_v38  ;;  %v1433_v63 = vand.u32 4294901760, %v169_v54  ;;  %v321_v0 = vand.u32 4294901760, %v320_v52  ;;  %v334_v1 = vsub.f32 %v1387_v43, %v333_v53  ;;  %v347_v2 = vand.u32 4294901760, %v1412_v55 }
  0x19   : > { %1010 = vmatprep.subr.mxu0 %v1226_v3  ;;  %1037 = vmatprep.subr.mxu1 %v1226_v3  ;;  %v1444_v8 = vsub.f32 %v171_v41, %v1398_v48  ;;  %v341_v9 = vsub.f32 %v1394_v47, %v340_v57  ;;  %v1451_v13 = vand.u32 4294901760, %v168_v60  ;;  %v328_v14 = vand.u32 4294901760, %v327_v58 }
  0x1a   : > { %1011 = vmatpush3.msra.mxu0 %v1311_v17  ;;  %1038 = vmatpush3.msra.mxu1 %v300_v44  ;;  %v354_v19 = vand.u32 4294901760, %v1427_v61  ;;  %v1456_v26 = vsub.f32 %v166_v50, %v1429_v62  ;;  %v1459_v31 = vsub.f32 %v170_v49, %v1421_v59  ;;  %v1463_v32 = vand.u32 4294901760, %v167_v7 }
  0x1b   : > { %1012 = vmatprep.subr.mxu0 %v1226_v3  ;;  %1039 = vmatprep.subr.mxu1 %v1226_v3  ;;  %v335_v33 = vand.u32 4294901760, %v334_v1  ;;  %v348_v36 = vsub.f32 %v1412_v55, %v347_v2  ;;  %v361_v37 = vand.u32 4294901760, %v1444_v8  ;;  %v1471_v38 = vsub.f32 %v169_v54, %v1433_v63 }
  0x1c   : > { %1013 = vmatpush3.msra.mxu0 %v1336_v25  ;;  %1040 = vmatpush3.msra.mxu1 %v307_v51  ;;  %v342_v39 = vand.u32 4294901760, %v341_v9  ;;  %v355_v41 = vsub.f32 %v1427_v61, %v354_v19  ;;  %v273_v42 = vand.u32 4294901760, %v1456_v26  ;;  %v368_v44 = vand.u32 4294901760, %v1459_v31 }
  0x1d   : > { %1014 = vmatprep.subr.mxu0 %v1226_v3  ;;  %1041 = vmatprep.subr.mxu1 %v1226_v3  ;;  %v1482_v49 = vsub.f32 %v168_v60, %v1451_v13  ;;  %v349_v50 = vand.u32 4294901760, %v348_v36  ;;  %v362_v51 = vsub.f32 %v1444_v8, %v361_v37  ;;  %v375_v52 = vand.u32 4294901760, %v1471_v38 }
  0x1e   : > { %1015 = vmatpush3.msra.mxu0 %v1343_v28  ;;  %1042 = vmatpush3.msra.mxu1 %v314_v56  ;;  %v1492_v54 = vsub.f32 %v167_v7, %v1463_v32  ;;  %v356_v56 = vand.u32 4294901760, %v355_v41  ;;  %v274_v58 = vsub.f32 %v1456_v26, %v273_v42  ;;  %v369_v60 = vsub.f32 %v1459_v31, %v368_v44 }
  0x1f   : > { %1016 = vmatprep.subr.mxu0 %v1226_v3  ;;  %1043 = vmatprep.subr.mxu1 %v1226_v3  ;;  %v363_v1 = vand.u32 4294901760, %v362_v51  ;;  %v376_v7 = vsub.f32 %v1471_v38, %v375_v52  ;;  %vm831_vm1 = vcmask 31744  }
  0x20   : > { %1017 = vmatpush3.msra.mxu0 %v1364_v35  ;;  %1044 = vmatpush3.msra.mxu1 %v321_v0  ;;  %v382_v0 = vand.u32 4294901760, %v1482_v49  ;;  %v389_v9 = vand.u32 4294901760, %v1492_v54 }
  0x21   : > { %1018 = vmatprep.subr.mxu0 %v1226_v3  ;;  %1045 = vmatprep.subr.mxu1 %v1226_v3 }
  0x22   : > { %1019 = vmatpush3.msra.mxu0 %v1390_v45  ;;  %1046 = vmatpush3.msra.mxu1 %v328_v14  ;;  %v275_v14 = vand.u32 4294901760, %v274_v58  ;;  %v383_v36 = vsub.f32 %v1482_v49, %v382_v0  ;;  %v390_v41 = vsub.f32 %v1492_v54, %v389_v9 }
  0x23   : > { %1020 = vmatprep.subr.mxu0 %v1226_v3  ;;  %1047 = vmatprep.subr.mxu1 %v1226_v3 }
  0x24   : > { %1021 = vmatpush3.msra.mxu0 %v1398_v48  ;;  %1048 = vmatpush3.msra.mxu1 %v335_v33  ;;  %v370_v33 = vand.u32 4294901760, %v369_v60  ;;  %v391_v51 = vand.u32 4294901760, %v390_v41 }
  0x25   : > { %1022 = vmatprep.subr.mxu0 %v1226_v3  ;;  %1049 = vmatprep.subr.mxu1 %v1226_v3 }
  0x26   : > { %1023 = vmatpush3.msra.mxu0 %v1421_v59  ;;  %1050 = vmatpush3.msra.mxu1 %v342_v39  ;;  %v377_v39 = vand.u32 4294901760, %v376_v7 }
  0x27   : > { %1024 = vmatprep.subr.mxu0 %v1226_v3  ;;  %1051 = vmatprep.subr.mxu1 %v1226_v3 }
  0x28   : > { %1025 = vmatpush3.msra.mxu0 %v1433_v63  ;;  %1052 = vmatpush3.msra.mxu1 %v349_v50  ;;  %v384_v50 = vand.u32 4294901760, %v383_v36 }
  0x29   : > { %1026 = vmatprep.subr.mxu0 %v1226_v3  ;;  %1053 = vmatprep.subr.mxu1 %v1226_v3 }
  0x2a   : > { %1027 = vmatpush3.msra.mxu0 %v1451_v13  ;;  %1054 = vmatpush3.msra.mxu1 %v356_v56 }
  0x2b   : > { %1028 = vmatprep.subr.mxu0 %v1226_v3  ;;  %1055 = vmatprep.subr.mxu1 %v1226_v3 }
  0x2c   : > { %1029 = vmatpush3.msra.mxu0 %v1463_v32  ;;  %1056 = vmatpush3.msra.mxu1 %v363_v1 }
  0x2d   : > { %1057 = vmatprep.subr.mxu1 %v1226_v3  ;;  %1068 = vmatprep.subr.mxu0 %v1226_v3 }
  0x2e   : > { %1031 = vmatmul.mubr.f32.vlgmr.msra.gmra.mxu0 %v275_v14  ;;  %1058 = vmatpush3.msra.mxu1 %v370_v33 }
  0x2f   : > { %1069 = vmatpush3.msra.mxu0 %v1306_v15  ;;  %1059 = vmatprep.subr.mxu1 %v1226_v3 }
  0x30   : > { %1070 = vmatprep.subr.mxu0 %v1226_v3  ;;  %1060 = vmatpush3.msra.mxu1 %v377_v39 }
  0x31   : > { %1071 = vmatpush3.msra.mxu0 %v1309_v16  ;;  %1061 = vmatprep.subr.mxu1 %v1226_v3 }
  0x32   : > { %1072 = vmatprep.subr.mxu0 %v1226_v3  ;;  %1062 = vmatpush3.msra.mxu1 %v384_v50 }
  0x33   : > { %1073 = vmatpush3.msra.mxu0 %v1314_v18  ;;  %1063 = vmatprep.subr.mxu1 %v1226_v3 }
  0x34   : > { %1074 = vmatprep.subr.mxu0 %v1226_v3  ;;  %1064 = vmatpush3.msra.mxu1 %v391_v51 }
  0x35   : > { %1075 = vmatpush3.msra.mxu0 %v1327_v20  ;;  %1066 = vmatmul.mubr.f32.vlgmr.msra.gmra.mxu1 %v1429_v62 }
  0x36   : > { %1076 = vmatprep.subr.mxu0 %v1226_v3  ;;  %1103 = vmatprep.subr.mxu1 %v1226_v3 }
  0x37   : > { %1077 = vmatpush3.msra.mxu0 %v1330_v21  ;;  %1104 = vmatpush3.msra.mxu1 %v1272_v4 }
  0x38   : > { %1078 = vmatprep.subr.mxu0 %v1226_v3  ;;  %1105 = vmatprep.subr.mxu1 %v1226_v3 }
  0x39   : > { %1079 = vmatpush3.msra.mxu0 %v1347_v30  ;;  %1106 = vmatpush3.msra.mxu1 %v1274_v5 }
  0x3a   : > { %1080 = vmatprep.subr.mxu0 %v1226_v3  ;;  %1107 = vmatprep.subr.mxu1 %v1226_v3 }
  0x3b   : > { %1081 = vmatpush3.msra.mxu0 %v1361_v34  ;;  %1108 = vmatpush3.msra.mxu1 %v1276_v6 }
  0x3c   : > { %1082 = vmatprep.subr.mxu0 %v1226_v3  ;;  %1109 = vmatprep.subr.mxu1 %v1226_v3 }
  0x3d   : > { %1083 = vmatpush3.msra.mxu0 %v1387_v43  ;;  %1110 = vmatpush3.msra.mxu1 %v1288_v10 }
  0x3e   : > { %1084 = vmatprep.subr.mxu0 %v1226_v3  ;;  %1111 = vmatprep.subr.mxu1 %v1226_v3 }
  0x3f   : > { %1085 = vmatpush3.msra.mxu0 %v1394_v47  ;;  %1112 = vmatpush3.msra.mxu1 %v1290_v11 }
  0x40   : > { %1086 = vmatprep.subr.mxu0 %v1226_v3  ;;  %1113 = vmatprep.subr.mxu1 %v1226_v3 }
  0x41   : > { %1087 = vmatpush3.msra.mxu0 %v1412_v55  ;;  %1114 = vmatpush3.msra.mxu1 %v1292_v12 }
  0x42   : > { %1088 = vmatprep.subr.mxu0 %v1226_v3  ;;  %1115 = vmatprep.subr.mxu1 %v1226_v3 }
  0x43   : > { %1089 = vmatpush3.msra.mxu0 %v1427_v61  ;;  %1116 = vmatpush3.msra.mxu1 %v1311_v17 }
  0x44   : > { %1090 = vmatprep.subr.mxu0 %v1226_v3  ;;  %1117 = vmatprep.subr.mxu1 %v1226_v3 }
  0x45   : > { %1091 = vmatpush3.msra.mxu0 %v1444_v8  ;;  %1118 = vmatpush3.msra.mxu1 %v1336_v25 }
  0x46   : > { %1092 = vmatprep.subr.mxu0 %v1226_v3  ;;  %1119 = vmatprep.subr.mxu1 %v1226_v3 }
  0x47   : > { %1093 = vmatpush3.msra.mxu0 %v1459_v31  ;;  %1120 = vmatpush3.msra.mxu1 %v1343_v28 }
  0x48   : > { %1094 = vmatprep.subr.mxu0 %v1226_v3  ;;  %1121 = vmatprep.subr.mxu1 %v1226_v3 }
  0x49   : > { %1095 = vmatpush3.msra.mxu0 %v1471_v38  ;;  %1122 = vmatpush3.msra.mxu1 %v1364_v35 }
  0x4a   : > { %1096 = vmatprep.subr.mxu0 %v1226_v3  ;;  %1123 = vmatprep.subr.mxu1 %v1226_v3 }
  0x4b   : > { %1097 = vmatpush3.msra.mxu0 %v1482_v49  ;;  %1124 = vmatpush3.msra.mxu1 %v1390_v45 }
  0x4c   : > { %1098 = vmatprep.subr.mxu0 %v1226_v3  ;;  %1125 = vmatprep.subr.mxu1 %v1226_v3 }
  0x4d   : > { %1099 = vmatpush3.msra.mxu0 %v1492_v54  ;;  %1100 = vmatprep.mubr.msk.f32.mxu0 %vm1227_vm0, %v1226_v3 }
  0x4e   : > { %1126 = vmatpush3.msra.mxu1 %v1398_v48  ;;  %1101 = vmatmul.mubr.f32.vlgmr.msra.gmra.mxu0 %v1456_v26 }
  0x4f   : > { %1127 = vmatprep.subr.mxu1 %v1226_v3  ;;  %1138 = vmatprep.subr.mxu0 %v1226_v3 }
  0x50   : > { %1128 = vmatpush3.msra.mxu1 %v1421_v59  ;;  %1139 = vmatpush3.msra.mxu0 %v284_v22 }
  0x51   : > { %1129 = vmatprep.subr.mxu1 %v1226_v3  ;;  %1140 = vmatprep.subr.mxu0 %v1226_v3 }
  0x52   : > { %1130 = vmatpush3.msra.mxu1 %v1433_v63  ;;  %1141 = vmatpush3.msra.mxu0 %v291_v23 }
  0x53   : > { %1131 = vmatprep.subr.mxu1 %v1226_v3  ;;  %1142 = vmatprep.subr.mxu0 %v1226_v3 }
  0x54   : > { %1132 = vmatpush3.msra.mxu1 %v1451_v13  ;;  %1143 = vmatpush3.msra.mxu0 %v298_v24 }
  0x55   : > { %1133 = vmatprep.subr.mxu1 %v1226_v3  ;;  %1144 = vmatprep.subr.mxu0 %v1226_v3 }
  0x56   : > { %1134 = vmatpush3.msra.mxu1 %v1463_v32  ;;  %1135 = vmatprep.mubr.msk.f32.mxu1 %vm1227_vm0, %v1226_v3 }
  0x57   : > { %1145 = vmatpush3.msra.mxu0 %v305_v27  ;;  %1136 = vmatmul.mubr.f32.vlgmr.msra.gmra.mxu1 %v273_v42 }
  0x58   : > { %1146 = vmatprep.subr.mxu0 %v1226_v3  ;;  %1173 = vmatprep.subr.mxu1 %v1226_v3 }
  0x59   : > { %1147 = vmatpush3.msra.mxu0 %v312_v29  ;;  %1174 = vmatpush3.msra.mxu1 %v1272_v4 }
  0x5a   : > { %1148 = vmatprep.subr.mxu0 %v1226_v3  ;;  %1175 = vmatprep.subr.mxu1 %v1226_v3 }
  0x5b   : > { %1149 = vmatpush3.msra.mxu0 %v319_v40  ;;  %1176 = vmatpush3.msra.mxu1 %v1274_v5 }
  0x5c   : > { %1150 = vmatprep.subr.mxu0 %v1226_v3  ;;  %1177 = vmatprep.subr.mxu1 %v1226_v3 }
  0x5d   : > { %1151 = vmatpush3.msra.mxu0 %v326_v46  ;;  %1178 = vmatpush3.msra.mxu1 %v1276_v6 }
  0x5e   : > { %1152 = vmatprep.subr.mxu0 %v1226_v3  ;;  %1179 = vmatprep.subr.mxu1 %v1226_v3 }
  0x5f   : > { %1153 = vmatpush3.msra.mxu0 %v333_v53  ;;  %1180 = vmatpush3.msra.mxu1 %v1288_v10 }
  0x60   : > { %1154 = vmatprep.subr.mxu0 %v1226_v3  ;;  %1181 = vmatprep.subr.mxu1 %v1226_v3 }
  0x61   : > { %1155 = vmatpush3.msra.mxu0 %v340_v57  ;;  %1182 = vmatpush3.msra.mxu1 %v1290_v11 }
  0x62   : > { %1156 = vmatprep.subr.mxu0 %v1226_v3  ;;  %1183 = vmatprep.subr.mxu1 %v1226_v3 }
  0x63   : > { %1157 = vmatpush3.msra.mxu0 %v347_v2  ;;  %1184 = vmatpush3.msra.mxu1 %v1292_v12 }
  0x64   : > { %1158 = vmatprep.subr.mxu0 %v1226_v3  ;;  %1185 = vmatprep.subr.mxu1 %v1226_v3 }
  0x65   : > { %1159 = vmatpush3.msra.mxu0 %v354_v19  ;;  %1186 = vmatpush3.msra.mxu1 %v1311_v17  ;;  %v893_v17 = vld [vmem:[%s1698_s2] ss:$0 sm:$0xff] }
  0x66   : > { %1160 = vmatprep.subr.mxu0 %v1226_v3  ;;  %1187 = vmatprep.subr.mxu1 %v1226_v3 }
  0x67   : > { %1161 = vmatpush3.msra.mxu0 %v361_v37  ;;  %1188 = vmatpush3.msra.mxu1 %v1336_v25 }
  0x68   : > { %1162 = vmatprep.subr.mxu0 %v1226_v3  ;;  %1189 = vmatprep.subr.mxu1 %v1226_v3 }
  0x69   : > { %1163 = vmatpush3.msra.mxu0 %v368_v44  ;;  %1190 = vmatpush3.msra.mxu1 %v1343_v28 }
  0x6a   : > { %1164 = vmatprep.subr.mxu0 %v1226_v3  ;;  %1191 = vmatprep.subr.mxu1 %v1226_v3 }
  0x6b   : > { %1165 = vmatpush3.msra.mxu0 %v375_v52  ;;  %1192 = vmatpush3.msra.mxu1 %v1364_v35 }
  0x6c   : > { %1166 = vmatprep.subr.mxu0 %v1226_v3  ;;  %1193 = vmatprep.subr.mxu1 %v1226_v3 }
  0x6d   : > { %1167 = vmatpush3.msra.mxu0 %v382_v0  ;;  %1194 = vmatpush3.msra.mxu1 %v1390_v45 }
  0x6e   : > { %1168 = vmatprep.subr.mxu0 %v1226_v3  ;;  %1195 = vmatprep.subr.mxu1 %v1226_v3 }
  0x6f   : > { %1169 = vmatpush3.msra.mxu0 %v389_v9  ;;  %1170 = vmatprep.mubr.msk.f32.mxu0 %vm1227_vm0, %v1226_v3 }
  0x70   : > { %1196 = vmatpush3.msra.mxu1 %v1398_v48  ;;  %1171 = vmatmul.mubr.f32.vlgmr.msra.gmra.mxu0 %v1429_v62 }
  0x71   : > { %1197 = vmatprep.subr.mxu1 %v1226_v3  ;;  %1205 = vmatprep.mubr.msk.f32.mxu1 %vm1227_vm0, %v1226_v3 }
  0x72   : > { %1198 = vmatpush3.msra.mxu1 %v1421_v59 }
  0x73   : > { %1199 = vmatprep.subr.mxu1 %v1226_v3 }
  0x74   : > { %1200 = vmatpush3.msra.mxu1 %v1433_v63 }
  0x75   : > { %1201 = vmatprep.subr.mxu1 %v1226_v3 }
  0x76   : > { %1202 = vmatpush3.msra.mxu1 %v1451_v13 }
  0x77   : > { %1203 = vmatprep.subr.mxu1 %v1226_v3 }
  0x78   : > { %1204 = vmatpush3.msra.mxu1 %v1463_v32 }
  0x79   : > { %1206 = vmatmul.mubr.f32.vlgmr.msra.gmra.mxu1 %v1429_v62 }
  0xee   : > { %v277_v4 = vpop.f32.mrf.mxu0 }
  0xef   : > { %v278_v18 = vadd.f32 %v893_v17, %v277_v4 }
  0xf0   : > { %v1032_v5 = vpop.f32.mrf.mxu0 }
  0xf5   : > { %v428_v6 = vpop.f32.mrf.mxu1 }
  0xf6   : > { %v429_v3 = vadd.f32 %v428_v6, %v278_v18 }
  0xf7   : > { %v1067_v10 = vpop.f32.mrf.mxu1 }
 0x10e   : > { %v532_v11 = vpop.f32.mrf.mxu0 }
 0x10f   : > { %v533_v22 = vadd.f32 %v532_v11, %v429_v3 }
 0x110   : > { %v1102_v12 = vpop.f32.mrf.mxu0 }
 0x117   : > { %v621_v15 = vpop.f32.mrf.mxu1 }
 0x118   : > { %v622_v23 = vadd.f32 %v621_v15, %v533_v22 }
 0x119   : > { %v1137_v16 = vpop.f32.mrf.mxu1 }
 0x130   : > { %v740_v20 = vpop.f32.mrf.mxu0 }
 0x131   : > { %v741_v24 = vadd.f32 %v740_v20, %v622_v23 }
 0x132   : > { %v1172_v21 = vpop.f32.mrf.mxu0 }
 0x139   : > { %v827_v25 = vpop.f32.mrf.mxu1 }
 0x13a   : > { %v828_v27 = vadd.f32 %v827_v25, %v741_v24 }
 0x13b   : > { %v1207_v28 = vpop.f32.mrf.mxu1 }
 0x13c   : > { %832 = vst.msk [vmem:[%s165_s30] sm:$0xff] %vm831_vm1, %v828_v27 }
 0x13d PF: > { %s13_s12 = sadd.s32 1, %s1224_s12  }
 0x13e   : > { %p10_p4 = scmp.ge.s32.totalorder %s13_s12, 4  }
 0x140   :  { %12 = sbr.rel (!%p10_p4) target bundleno = 1 (0x1), region = 62 }

</bundles_post_ra>
